<compile_context>
chip_gen: v7x
topology: tpu7x:2x2x1
jax: 0.10.0
libtpu: 0.0.40
codegen_flags: <defaults>
</compile_context>

<pallas_src>
import functools

import jax
import jax.numpy as jnp
from jax import lax
from jax.experimental import pallas as pl
from jax.experimental.pallas import tpu as pltpu

LANES = 128
BASE_ROW_TILE = 4096            # rows per grid step for f32 (2 MiB / input buffer)
CHUNK_ROWS = 512                # rows per in-kernel accumulation chunk
PARALLEL_MIN_ELEMS = 2 * 128 * 1024   # >= 256 Ki elements -> split across 2 TCs


def _round_up(x: int, m: int) -> int:
    return ((x + m - 1) // m) * m


def _mse_kernel(p_ref, a_ref, o_ref, *, valid_rows, row_tile, num_inner,
                chunk_rows, sublane):
    c = pl.program_id(0)
    i = pl.program_id(1)

    @pl.when(i == 0)
    def _():
        o_ref[...] = jnp.zeros_like(o_ref)

    # Global (UNclamped) block index and first row of this block.  The
    # index_map clamps the DMA to the last in-bounds block, so a trailing
    # duplicate block (odd block count split over 2 outer slices) simply
    # re-reads valid data and is fully masked to zero here.
    row_start = (c * num_inner + i) * row_tile
    num_chunks = row_tile // chunk_rows

    def chunk_sqdiff(j):
        s = pl.multiple_of(j * chunk_rows, sublane)
        d = (p_ref[pl.ds(s, chunk_rows), :].astype(jnp.float32)
             - a_ref[pl.ds(s, chunk_rows), :].astype(jnp.float32))
        return d * d

    def body_full(j, acc):
        sq = chunk_sqdiff(j)
        return acc + jnp.sum(sq.reshape(-1, 8, LANES), axis=0)

    def body_masked(j, acc):
        sq = chunk_sqdiff(j)
        rid = (row_start + j * chunk_rows
               + lax.broadcasted_iota(jnp.int32, sq.shape, 0))
        sq = jnp.where(rid < valid_rows, sq, 0.0)
        return acc + jnp.sum(sq.reshape(-1, 8, LANES), axis=0)

    zero = jnp.zeros((8, LANES), jnp.float32)

    # Hot path: block fully in bounds -> pure VPU adds, no mask work.
    @pl.when(row_start + row_tile <= valid_rows)
    def _():
        o_ref[...] += lax.fori_loop(0, num_chunks, body_full, zero)

    # Edge path: final partial block (and any duplicate block) gets masked.
    @pl.when(row_start + row_tile > valid_rows)
    def _():
        o_ref[...] += lax.fori_loop(0, num_chunks, body_masked, zero)


def mse_loss_pallas(param_pred: jax.Array, param_actual: jax.Array) -> jax.Array:
    assert param_pred.shape == param_actual.shape, "shape mismatch"
    n_true = param_pred.size
    assert n_true > 0

    isz_p = jnp.dtype(param_pred.dtype).itemsize
    isz_a = jnp.dtype(param_actual.dtype).itemsize
    # Sublane packing of the most tightly packed dtype: f32 -> 8, bf16 -> 16, int8 -> 32.
    sublane = 8 * max(1, 4 // min(isz_p, isz_a))
    # Scale the row tile by the widest dtype so bytes/step stay ~2 MiB/buffer.
    max_row_tile = BASE_ROW_TILE * max(1, 4 // max(isz_p, isz_a))

    rows_raw = pl.cdiv(n_true, LANES)
    if rows_raw >= max_row_tile:
        row_tile = max_row_tile
        rows_arr = rows_raw          # trailing partial block masked in-kernel
    else:
        row_tile = _round_up(rows_raw, sublane)
        rows_arr = row_tile          # single exact block

    padded_size = rows_arr * LANES
    p = param_pred.reshape(-1)
    a = param_actual.reshape(-1)
    if padded_size != n_true:
        # Fires only for lane-unaligned (n % 128 != 0) or tiny row-unaligned
        # inputs.  Padded slots are zero in BOTH arrays -> contribute 0 to the
        # sum; the divisor below is the true element count.
        # TODO(synk): a 1D-blocked kernel variant would avoid this copy for
        # huge lane-unaligned inputs; real tensors are virtually always aligned.
        p = jnp.pad(p, (0, padded_size - n_true))
        a = jnp.pad(a, (0, padded_size - n_true))
    p = p.reshape(rows_arr, LANES)
    a = a.reshape(rows_arr, LANES)

    num_blocks = pl.cdiv(rows_arr, row_tile)
    # Outer "parallel" axis: ~2x aggregate HBM bandwidth on dual-TC chips
    # (v7x megacore); a harmless serial 2-iteration loop on v5e/v6e.
    num_outer = 2 if (rows_arr * LANES >= PARALLEL_MIN_ELEMS
                      and num_blocks >= 2) else 1
    num_inner = pl.cdiv(num_blocks, num_outer)

    chunk_rows = CHUNK_ROWS if row_tile % CHUNK_ROWS == 0 else row_tile

    def in_map(c, i):
        # Clamp so a trailing duplicate block never issues an OOB DMA; the
        # kernel masks its contribution to exactly zero.
        return (jnp.minimum(c * num_inner + i, num_blocks - 1), 0)

    kernel = functools.partial(
        _mse_kernel, valid_rows=rows_arr, row_tile=row_tile,
        num_inner=num_inner, chunk_rows=chunk_rows, sublane=sublane)

    partials = pl.pallas_call(
        kernel,
        out_shape=jax.ShapeDtypeStruct((num_outer * 8, LANES), jnp.float32),
        grid_spec=pltpu.PrefetchScalarGridSpec(
            num_scalar_prefetch=0,
            grid=(num_outer, num_inner),
            in_specs=[
                pl.BlockSpec((row_tile, LANES), in_map),
                pl.BlockSpec((row_tile, LANES), in_map),
            ],
            # Output block index is constant along the inner (reduction) axis,
            # so it stays resident in VMEM and acts as the accumulator.
            out_specs=pl.BlockSpec((8, LANES), lambda c, i: (c, 0)),
        ),
        compiler_params=pltpu.CompilerParams(
            dimension_semantics=("parallel", "arbitrary"),
        ),
        cost_estimate=pl.CostEstimate(
            flops=3 * n_true,
            transcendentals=0,
            bytes_accessed=n_true * (isz_p + isz_a) + num_outer * 8 * LANES * 4,
        ),
    )(p, a)

    # Tiny epilogue: single cross-lane reduce + divide by the TRUE count.
    return jnp.sum(partials) / n_true


if __name__ == "__main__":
    key = jax.random.PRNGKey(0)
    k1, k2, k3, k4, k5, k6 = jax.random.split(key, 6)

    # Small, lane-aligned case (zero-copy single-block path).
    shape = (2, 4, 16, 16)
    p1 = jax.random.normal(k1, shape, dtype=jnp.float32)
    a1 = jax.random.normal(k2, shape, dtype=jnp.float32)
    loss1 = mse_loss_pallas(p1, a1)
    jax.block_until_ready(loss1)
    ref1 = jnp.mean((p1 - a1) ** 2)
    assert jnp.allclose(loss1, ref1, rtol=1e-5, atol=1e-6), (loss1, ref1)

    # Tiny, lane-unaligned case (exercises the small padded fallback path).
    shape2 = (3, 5, 7)
    p2 = jax.random.normal(k3, shape2, dtype=jnp.float32)
    a2 = jax.random.normal(k4, shape2, dtype=jnp.float32)
    loss2 = mse_loss_pallas(p2, a2)
    jax.block_until_ready(loss2)
    ref2 = jnp.mean((p2 - a2) ** 2)
    assert jnp.allclose(loss2, ref2, rtol=1e-5, atol=1e-6), (loss2, ref2)

    # Moderate case: zero-copy cdiv grid, in-kernel masking of the final
    # partial block, 2-way outer split with an odd block count (duplicate
    # block clamped + masked).
    shape3 = (10000, 128)
    p3 = jax.random.normal(k5, shape3, dtype=jnp.float32)
    a3 = jax.random.normal(k6, shape3, dtype=jnp.float32)
    loss3 = mse_loss_pallas(p3, a3)
    jax.block_until_ready(loss3)
    ref3 = jnp.mean((p3 - a3) ** 2)
    assert jnp.allclose(loss3, ref3, rtol=1e-4, atol=1e-6), (loss3, ref3)

    print("KERNEL_OK")
</pallas_src>

<mosaic_0001>
module attributes {stable_mosaic.version = 11 : i64} {
  func.func @_mse_kernel(%arg0: i32, %arg1: i32, %arg2: memref<16x128xf32, #tpu.memory_space<vmem>>, %arg3: memref<16x128xf32, #tpu.memory_space<vmem>>, %arg4: memref<8x128xf32, #tpu.memory_space<vmem>>) attributes {dimension_semantics = [#tpu.dimension_semantics<parallel>, #tpu.dimension_semantics<arbitrary>], iteration_bounds = array<i64: 1, 1>, scalar_prefetch = 0 : i64, scratch_operands = 0 : i64, tpu.core_type = #tpu.core_type<tc>, window_params = [{transform_indices = @transform_0, window_bounds = array<i64: 16, 128>}, {transform_indices = @transform_1, window_bounds = array<i64: 16, 128>}, {transform_indices = @transform_2, window_bounds = array<i64: 8, 128>}]} {
    %c0_i32 = arith.constant 0 : i32
    %0 = arith.cmpi eq, %arg1, %c0_i32 : i32
    %1 = arith.extui %0 : i1 to i32
    %c0_i32_0 = arith.constant 0 : i32
    %2 = arith.cmpi ne, %1, %c0_i32_0 : i32
    scf.if %2 {
      %cst_7 = arith.constant 0.000000e+00 : f32
      %15 = vector.broadcast %cst_7 : f32 to vector<8x128xf32>
      %c0 = arith.constant 0 : index
      %c0_8 = arith.constant 0 : index
      %16 = vector.load %arg4[%c0, %c0_8] : memref<8x128xf32, #tpu.memory_space<vmem>>, vector<8x128xf32>
      tpu.vector_store %arg4[%c0, %c0_8], %15 {strides = array<i32>} : memref<8x128xf32, #tpu.memory_space<vmem>>, vector<8x128xf32>,
    } else {
    }
    %c1_i32 = arith.constant 1 : i32
    %3 = arith.muli %arg0, %c1_i32 : i32
    %4 = arith.addi %3, %arg1 : i32
    %c16_i32 = arith.constant 16 : i32
    %5 = arith.muli %4, %c16_i32 : i32
    %cst = arith.constant 0.000000e+00 : f32
    %6 = vector.broadcast %cst : f32 to vector<8x128xf32>
    %c16_i32_1 = arith.constant 16 : i32
    %7 = arith.addi %5, %c16_i32_1 : i32
    %c16_i32_2 = arith.constant 16 : i32
    %8 = arith.cmpi sle, %7, %c16_i32_2 : i32
    %9 = arith.extui %8 : i1 to i32
    %c0_i32_3 = arith.constant 0 : i32
    %10 = arith.cmpi ne, %9, %c0_i32_3 : i32
    scf.if %10 {
      %c0 = arith.constant 0 : index
      %c0_7 = arith.constant 0 : index
      %15 = vector.load %arg4[%c0, %c0_7] : memref<8x128xf32, #tpu.memory_space<vmem>>, vector<8x128xf32>
      %c0_i32_8 = arith.constant 0 : i32
      %c16_i32_9 = arith.constant 16 : i32
      %16 = arith.muli %c0_i32_8, %c16_i32_9 : i32
      %17 = tpu.assume_multiple %16, 8 : i32
      %18 = arith.index_cast %17 : i32 to index
      %c0_10 = arith.constant 0 : index
      %19 = vector.load %arg2[%18, %c0_10] : memref<16x128xf32, #tpu.memory_space<vmem>>, vector<16x128xf32>
      %20 = arith.index_cast %17 : i32 to index
      %c0_11 = arith.constant 0 : index
      %21 = vector.load %arg3[%20, %c0_11] : memref<16x128xf32, #tpu.memory_space<vmem>>, vector<16x128xf32>
      %22 = arith.subf %19, %21 : vector<16x128xf32>
      %23 = arith.mulf %22, %22 : vector<16x128xf32>
      %24 = vector.shape_cast %23 : vector<16x128xf32> to vector<2x8x128xf32>
      %cst_12 = arith.constant dense<0.000000e+00> : vector<8x128xf32>
      %25 = vector.multi_reduction <add>, %24, %cst_12 [0] : vector<2x8x128xf32> to vector<8x128xf32>
      %26 = arith.addf %6, %25 : vector<8x128xf32>
      %c1_i32_13 = arith.constant 1 : i32
      %27 = arith.addf %15, %26 : vector<8x128xf32>
      %c0_14 = arith.constant 0 : index
      %c0_15 = arith.constant 0 : index
      %28 = vector.load %arg4[%c0_14, %c0_15] : memref<8x128xf32, #tpu.memory_space<vmem>>, vector<8x128xf32>
      tpu.vector_store %arg4[%c0_14, %c0_15], %27 {strides = array<i32>} : memref<8x128xf32, #tpu.memory_space<vmem>>, vector<8x128xf32>,
    } else {
    }
    %c16_i32_4 = arith.constant 16 : i32
    %11 = arith.addi %5, %c16_i32_4 : i32
    %c16_i32_5 = arith.constant 16 : i32
    %12 = arith.cmpi sgt, %11, %c16_i32_5 : i32
    %13 = arith.extui %12 : i1 to i32
    %c0_i32_6 = arith.constant 0 : i32
    %14 = arith.cmpi ne, %13, %c0_i32_6 : i32
    scf.if %14 {
      %c0 = arith.constant 0 : index
      %c0_7 = arith.constant 0 : index
      %15 = vector.load %arg4[%c0, %c0_7] : memref<8x128xf32, #tpu.memory_space<vmem>>, vector<8x128xf32>
      %c0_i32_8 = arith.constant 0 : i32
      %c16_i32_9 = arith.constant 16 : i32
      %16 = arith.muli %c0_i32_8, %c16_i32_9 : i32
      %17 = tpu.assume_multiple %16, 8 : i32
      %18 = arith.index_cast %17 : i32 to index
      %c0_10 = arith.constant 0 : index
      %19 = vector.load %arg2[%18, %c0_10] : memref<16x128xf32, #tpu.memory_space<vmem>>, vector<16x128xf32>
      %20 = arith.index_cast %17 : i32 to index
      %c0_11 = arith.constant 0 : index
      %21 = vector.load %arg3[%20, %c0_11] : memref<16x128xf32, #tpu.memory_space<vmem>>, vector<16x128xf32>
      %22 = arith.subf %19, %21 : vector<16x128xf32>
      %23 = arith.mulf %22, %22 : vector<16x128xf32>
      %c16_i32_12 = arith.constant 16 : i32
      %24 = arith.muli %c0_i32_8, %c16_i32_12 : i32
      %25 = arith.addi %5, %24 : i32
      %26 = tpu.iota {dimensions = array<i32: 0>} : vector<16x128xi32>
      %27 = vector.broadcast %25 : i32 to vector<16x128xi32>
      %28 = arith.addi %27, %26 : vector<16x128xi32>
      %c16_i32_13 = arith.constant 16 : i32
      %29 = vector.broadcast %c16_i32_13 : i32 to vector<16x128xi32>
      %30 = arith.cmpi slt, %28, %29 : vector<16x128xi32>
      %cst_14 = arith.constant 0.000000e+00 : f32
      %31 = vector.broadcast %cst_14 : f32 to vector<16x128xf32>
      %32 = arith.select %30, %23, %31 : vector<16x128xi1>, vector<16x128xf32>
      %33 = vector.shape_cast %32 : vector<16x128xf32> to vector<2x8x128xf32>
      %cst_15 = arith.constant dense<0.000000e+00> : vector<8x128xf32>
      %34 = vector.multi_reduction <add>, %33, %cst_15 [0] : vector<2x8x128xf32> to vector<8x128xf32>
      %35 = arith.addf %6, %34 : vector<8x128xf32>
      %c1_i32_16 = arith.constant 1 : i32
      %36 = arith.addf %15, %35 : vector<8x128xf32>
      %c0_17 = arith.constant 0 : index
      %c0_18 = arith.constant 0 : index
      %37 = vector.load %arg4[%c0_17, %c0_18] : memref<8x128xf32, #tpu.memory_space<vmem>>, vector<8x128xf32>
      tpu.vector_store %arg4[%c0_17, %c0_18], %36 {strides = array<i32>} : memref<8x128xf32, #tpu.memory_space<vmem>>, vector<8x128xf32>,
    } else {
    }
    return
  }
  func.func @transform_0(%arg0: i32, %arg1: i32) -> (i32, i32) {
    %c1_i32 = arith.constant 1 : i32
    %0 = arith.muli %arg0, %c1_i32 : i32
    %1 = arith.addi %0, %arg1 : i32
    %c0_i32 = arith.constant 0 : i32
    %2 = arith.minsi %1, %c0_i32 : i32
    %c0_i32_0 = arith.constant 0 : i32
    %c0_i32_1 = arith.constant 0 : i32
    return %2, %c0_i32_0 : i32, i32
  }
  func.func @transform_1(%arg0: i32, %arg1: i32) -> (i32, i32) {
    %c1_i32 = arith.constant 1 : i32
    %0 = arith.muli %arg0, %c1_i32 : i32
    %1 = arith.addi %0, %arg1 : i32
    %c0_i32 = arith.constant 0 : i32
    %2 = arith.minsi %1, %c0_i32 : i32
    %c0_i32_0 = arith.constant 0 : i32
    %c0_i32_1 = arith.constant 0 : i32
    return %2, %c0_i32_0 : i32, i32
  }
  func.func @transform_2(%arg0: i32, %arg1: i32) -> (i32, i32) {
    %c0_i32 = arith.constant 0 : i32
    %c0_i32_0 = arith.constant 0 : i32
    return %arg0, %c0_i32 : i32, i32
  }
}

</mosaic_0001>

<bundles_post_ra>
// kernel: tpu_custom_call.1
= control target key start
LH: loop header
LB: loop body
LE: loop exit
PB: predicated region body
PF: predicated region fallthrough
CT: control target
= control target key end

     0   :  { %7 = vsyncpa [#allocation3], 0  ;;  %s266_s0 = inlined_call_operand.hbm [shape: f32[16,128], index: 0, kind: input, shape index: {}]   ;;  %s267_s1 = inlined_call_operand.hbm [shape: f32[16,128], index: 1, kind: input, shape index: {}]   ;;  %s268_s2 = inlined_call_operand.hbm [shape: f32[8,128], index: 2, kind: output, shape index: {}]  }
   0x1   :  { %8 = vsyncpa [#allocation6], 0 }
   0x2   :  { %9 = vsyncpa [#allocation4], 0  ;;  %s210_s9 = smov [#allocation2]   ;;  %s138_s13 = scalar_lea.hbm %s266_s0, 256 }
   0x3   :  { %s21_s10 = sshll.u32 %s210_s9, 4  ;;  %p139_p0 = scmp.ne.s32.totalorder %s266_s0, %s138_s13  ;;  %s22_s10 = int_to_ptr.vmem [resolvable:$true] %s21_s10 }
   0x4   :  { %p142_p1 = scmp.lt.u32.totalorder %s138_s13, %s266_s0 }
   0x6   :  { %p144_p2 = pnand %p142_p1, %p139_p0 }
   0x8   :  { %147 = shalt.err (!%p144_p2)
}
   0x9   :  { %s148_s18 = scalar_lea.vmem %s22_s10, 256  ;;  %p153_p4 = scmp.lt.s32.totalorder %s22_s10, %s22_s10 }
   0xa   :  { %p149_p3 = scmp.ne.s32.totalorder %s22_s10, %s148_s18  ;;  %p154_p5 = scmp.lt.s32.totalorder %s148_s18, %s148_s18 }
   0xc   :  { %p155_p6 = por %p154_p5, %p153_p4 }
   0xe   :  { %p156_p7 = pnand %p155_p6, %p149_p3 }
  0x10   :  { %159 = shalt.err (!%p156_p7)
}
  0x11   :  { %s211_s19 = smov 128   ;;  %s212_s20 = smov 8  }
  0x12   :  { %27 = dma.hbm_to_vmem [thread:$0]  %s266_s0, 256, %s22_s10, [#allocation3], %s211_s19, %s211_s19, %s212_s20  }
  0x13   :  { %s213_s23 = smov [#allocation5]   ;;  %s160_s27 = scalar_lea.hbm %s267_s1, 256 }
  0x14   :  { %s39_s24 = sshll.u32 %s213_s23, 4  ;;  %p161_p8 = scmp.ne.s32.totalorder %s267_s1, %s160_s27  ;;  %s40_s24 = int_to_ptr.vmem [resolvable:$true] %s39_s24 }
  0x15   :  { %p164_p9 = scmp.lt.u32.totalorder %s160_s27, %s267_s1 }
  0x17   :  { %p166_p10 = pnand %p164_p9, %p161_p8 }
  0x19   :  { %169 = shalt.err (!%p166_p10)
}
  0x1a   :  { %s170_s4 = scalar_lea.vmem %s40_s24, 256  ;;  %p175_p12 = scmp.lt.s32.totalorder %s40_s24, %s40_s24 }
  0x1b   :  { %p171_p11 = scmp.ne.s32.totalorder %s40_s24, %s170_s4  ;;  %p176_p13 = scmp.lt.s32.totalorder %s170_s4, %s170_s4 }
  0x1d   :  { %p177_p0 = por %p176_p13, %p175_p12 }
  0x1f   :  { %p178_p1 = pnand %p177_p0, %p171_p11 }
  0x21   :  { %181 = shalt.err (!%p178_p1)
}
  0x22   :  { %45 = dma.hbm_to_vmem [thread:$0]  %s267_s1, 256, %s40_s24, [#allocation6], %s211_s19, %s211_s19, %s212_s20  }
  0x23   :  { %204 = dma.done.wait [#allocation3], 256  }
  0x24   :  { %205 = vsyncadd [#allocation3], 4294967040 }
  0x25   :  { %206 = dma.done.wait [#allocation6], 256  }
  0x26   :  { %207 = vsyncadd [#allocation6], 4294967040  ;;  %v73_v0 = vld [vmem:[#allocation2] sm:$0xff]  ;;  %v74_v1 = vld [vmem:[#allocation2 + $0x8] sm:$0xff]  ;;  %s214_s6 = smov [#allocation7]  }
  0x27   :  { %v75_v2 = vld [vmem:[#allocation5] sm:$0xff]  ;;  %v76_v3 = vld [vmem:[#allocation5 + $0x8] sm:$0xff]  ;;  %s118_s7 = sshll.u32 %s214_s6, 4  ;;  %s119_s7 = int_to_ptr.vmem [resolvable:$true] %s118_s7 }
  0x28   :  { %v77_v4 = vsub.f32 %v73_v0, %v75_v2  ;;  %v78_v5 = vsub.f32 %v74_v1, %v76_v3  ;;  %s182_s8 = scalar_lea.vmem %s119_s7, 128  ;;  %p187_p3 = scmp.lt.s32.totalorder %s119_s7, %s119_s7 }
  0x29   :  { %p183_p2 = scmp.ne.s32.totalorder %s119_s7, %s182_s8  ;;  %p188_p4 = scmp.lt.s32.totalorder %s182_s8, %s182_s8 }
  0x2a   :  { %v79_v6 = vmul.f32 %v77_v4, %v77_v4  ;;  %v80_v7 = vmul.f32 %v78_v5, %v78_v5 }
  0x2b   :  { %p189_p5 = por %p188_p4, %p187_p3 }
  0x2c   :  { %v81_v8 = vadd.f32 %v80_v7, %v79_v6 }
  0x2d   :  { %p190_p6 = pnand %p189_p5, %p183_p2 }
  0x2e   :  { %84 = vst [vmem:[#allocation7] sm:$0xff] %v81_v8 }
  0x2f   :  { %193 = shalt.err (!%p190_p6)
}
  0x30   :  { %s194_s10 = scalar_lea.hbm %s268_s2, 128 }
  0x31   :  { %p195_p7 = scmp.ne.s32.totalorder %s268_s2, %s194_s10  ;;  %p198_p8 = scmp.lt.u32.totalorder %s194_s10, %s268_s2 }
  0x33   :  { %p200_p9 = pnand %p198_p8, %p195_p7 }
  0x35   :  { %203 = shalt.err (!%p200_p9)
}
  0x36   :  { %121 = dma.vmem_to_hbm [thread:$0]  %s119_s7, 128, %s268_s2, [#allocation4]  }
  0x37   :  { %208 = dma.done.wait [#allocation4], 128  }
  0x38   :  { %209 = vsyncadd [#allocation4], 4294967168 }
  0x39   :  { %125 = vsyncpa [#allocation3], 1 }
  0x3a   :  { %126 = vsyncpa [#allocation6], 1 }
  0x3b   :  { %127 = vsyncpa [#allocation4], 1 }

</bundles_post_ra>
